<compile_context>
chip_gen: v6e
topology: v6e:2x2x1
jax: 0.10.0
libtpu: 0.0.40
codegen_flags: <defaults>
</compile_context>

<pallas_src>
import numpy as np
import jax
import jax.numpy as jnp
from jax import lax
from jax.experimental import pallas as pl
from jax.experimental.pallas import tpu as pltpu

# ---------------- module config (matches DynamicVFE defaults / __init__) ----------------
VOXEL_SIZE = (0.2, 0.2, 4.0)
PC_RANGE = (0.0, -40.0, -3.0, 70.4, 40.0, 1.0)
VX, VY, VZ = VOXEL_SIZE
X_OFFSET = VX / 2 + PC_RANGE[0]
Y_OFFSET = VY / 2 + PC_RANGE[1]
Z_OFFSET = VZ / 2 + PC_RANGE[2]
CANVAS_Z = int((PC_RANGE[5] - PC_RANGE[2]) / VZ)
CANVAS_Y = int((PC_RANGE[4] - PC_RANGE[1]) / VY)
CANVAS_X = int((PC_RANGE[3] - PC_RANGE[0]) / VX)
BN_EPS = 1e-3
FILL = np.int32(2**31 - 1)          # padding value for unused voxel slots

FEAT_CHANNELS = [16, 32]            # feat_channels
RAW_IN_CHANNELS = 4                 # in_channels before augmentation
# with_cluster_center=True (+3), with_voxel_center=True (+3), with_distance=True (+1)
IN_CHANNELS = RAW_IN_CHANNELS + 3 + 3 + 1

N_POINTS = 256
V_MAX = 128                          # static upper bound on #voxels (padded)


# ---------------------------- fused Pallas kernel ----------------------------
def _scatter_max_into(mask_ref, yt, out_ref):
    """Per-voxel max pool of point features.

    mask_ref: (V, N) {0,1} membership; yt: (C, N) post-ReLU (>= 0); out_ref: (V, C).
    Since yt >= 0, max_p mask[v,p]*yt[c,p] equals the max over the voxel's member points
    (0 for empty/padded voxel slots). One (V, N) product per channel keeps the live set
    at ~32 vregs and reduces over the lane axis -> no (V, N, C) broadcast / spills.
    """
    c_total = yt.shape[0]
    for c in range(c_total):
        prod = mask_ref[...] * yt[c:c + 1, :]                       # (V, N)
        out_ref[:, c:c + 1] = jnp.max(prod, axis=1, keepdims=True)  # (V, 1)


def _fused_vfe_kernel(seg_ref, feats_ref, featst_ref, augt_ref,
                      w1t_ref, s1_ref, b1_ref,
                      w2at_ref, w2bt_ref, s2_ref, b2_ref,
                      out_ref, mask_ref, vmax1_ref):
    v, n = mask_ref.shape

    # ---- one-hot point->voxel membership built in-kernel from segment ids ----
    seg = seg_ref[...]                                              # (1, N) int32
    mask_ref[...] = (lax.broadcasted_iota(jnp.int32, (v, n), 0)
                     == seg).astype(jnp.float32)
    maskf = mask_ref[...]
    cnt = jnp.sum(maskf, axis=1, keepdims=True)                     # (V, 1) pts per voxel

    featst = featst_ref[...]                                        # (4, N) = [x; y; z; r]

    # ---- cluster center: scatter-mean + map back to points (cluster_scatter, fused) ----
    vmean = jnp.dot(maskf, feats_ref[...],
                    preferred_element_type=jnp.float32) / jnp.maximum(cnt, 1.0)  # (V, 4)
    pmean_t = lax.dot_general(vmean[:, :3], maskf, (((0,), (0,)), ((), ())),
                              preferred_element_type=jnp.float32)                # (3, N)
    f_cluster_t = featst[0:3, :] - pmean_t                          # (3, N)

    # ---- VFE layer 0: Linear(no bias) + folded BN + ReLU; concat folded into split dots
    # input order matches the reference: [features(4) | f_cluster(3) | f_center(3), dist(1)]
    w1t = w1t_ref[...]                                              # (16, 11)
    y1t = (jnp.dot(w1t[:, 0:4], featst, preferred_element_type=jnp.float32)
           + jnp.dot(w1t[:, 4:7], f_cluster_t, preferred_element_type=jnp.float32)
           + jnp.dot(w1t[:, 7:11], augt_ref[...], preferred_element_type=jnp.float32))
    y1t = jnp.maximum(y1t * s1_ref[...] + b1_ref[...], 0.0)         # (16, N)

    # ---- vfe_scatter (max) + map voxel feats back to points ----
    _scatter_max_into(mask_ref, y1t, vmax1_ref)                     # (V, 16)
    p1t = lax.dot_general(vmax1_ref[...], mask_ref[...], (((0,), (0,)), ((), ())),
                          preferred_element_type=jnp.float32)       # (16, N)

    # ---- VFE layer 1 on concat([point_feats, voxel_feats_per_point]) via split weight --
    y2t = (jnp.dot(w2at_ref[...], y1t, preferred_element_type=jnp.float32)
           + jnp.dot(w2bt_ref[...], p1t, preferred_element_type=jnp.float32))
    y2t = jnp.maximum(y2t * s2_ref[...] + b2_ref[...], 0.0)         # (32, N)

    # ---- final vfe_scatter (max) straight into the output block ----
    _scatter_max_into(mask_ref, y2t, out_ref)                       # (V, 32)


# ---------------------------- glue: voxel bookkeeping ----------------------------
def _voxel_bookkeeping(coors):
    """Unique voxels (sorted, padded to V_MAX) + per-point segment id (V_MAX = dropped)."""
    czyx = CANVAS_Z * CANVAS_Y * CANVAS_X
    vids = (coors[:, 0] * czyx
            + coors[:, 1] * (CANVAS_Y * CANVAS_X)
            + coors[:, 2] * CANVAS_X
            + coors[:, 3]).astype(jnp.int32)
    uniq = jnp.unique(vids, size=V_MAX, fill_value=FILL)
    seg = jnp.searchsorted(uniq, vids).astype(jnp.int32)
    # guard: if #unique voxels > V_MAX, drop the truncated points (seg = V_MAX matches
    # no one-hot row) instead of corrupting another voxel's mean/max.
    seg_c = jnp.clip(seg, 0, V_MAX - 1)
    seg = jnp.where(uniq[seg_c] == vids, seg_c, jnp.int32(V_MAX))
    return uniq, seg


# ---------------------------- DynamicVFE forward ----------------------------
def dynamic_vfe_forward(features, coors, params):
    """features: (N, 4) float32 ; coors: (N, 4) int32 as (batch, z, y, x)."""
    n = features.shape[0]
    uniq, seg = _voxel_bookkeeping(coors)
    seg_row = seg.reshape(1, n)

    # tiny per-point augmentation that needs no scatter: voxel-center offsets + distance
    cf = coors.astype(jnp.float32)
    aug_t = jnp.stack(
        [features[:, 0] - (cf[:, 3] * VX + X_OFFSET),
         features[:, 1] - (cf[:, 2] * VY + Y_OFFSET),
         features[:, 2] - (cf[:, 1] * VZ + Z_OFFSET),
         jnp.sqrt(jnp.sum(features[:, :3] ** 2, axis=1))], axis=0)  # (4, N)
    feats_t = features.T                                            # (4, N)

    (w1, s1, b1), (w2, s2, b2) = params
    c1 = w1.shape[1]                                                # 16
    cout = w2.shape[1]                                              # 32
    w1t = w1.T                                                      # (16, 11)
    w2at = w2[:c1, :].T                                             # (32, 16) point_feats half
    w2bt = w2[c1:, :].T                                             # (32, 16) voxel_feats half
    s1c, b1c = s1.reshape(-1, 1), b1.reshape(-1, 1)                 # (16, 1)
    s2c, b2c = s2.reshape(-1, 1), b2.reshape(-1, 1)                 # (32, 1)

    voxel_feats = pl.pallas_call(
        _fused_vfe_kernel,
        out_shape=jax.ShapeDtypeStruct((V_MAX, cout), jnp.float32),
        scratch_shapes=[pltpu.VMEM((V_MAX, n), jnp.float32),        # one-hot mask (V, N)
                        pltpu.VMEM((V_MAX, c1), jnp.float32)],      # layer-0 voxel max
    )(seg_row, features, feats_t, aug_t,
      w1t, s1c, b1c, w2at, w2bt, s2c, b2c)

    # decode voxel coordinates (glue); padded slots -> -1
    czyx = CANVAS_Z * CANVAS_Y * CANVAS_X
    valid = uniq != FILL
    b = uniq // czyx
    rem = uniq % czyx
    z = rem // (CANVAS_Y * CANVAS_X)
    rem2 = rem % (CANVAS_Y * CANVAS_X)
    y = rem2 // CANVAS_X
    xx = rem2 % CANVAS_X
    voxel_coors = jnp.where(valid[:, None],
                            jnp.stack([b, z, y, xx], axis=1).astype(jnp.int32),
                            jnp.int32(-1))
    # TODO(synk): mmcv's DynamicScatter returns voxels in first-occurrence order with a
    # dynamic count; here they are sorted by linear coordinate and zero-padded to V_MAX.
    return voxel_feats, voxel_coors, jnp.sum(valid)


# ---------------------------- parameter init (deterministic, synthetic) ----------------------------
def init_params(key):
    chans = [IN_CHANNELS] + list(FEAT_CHANNELS)
    params = []
    for i in range(len(chans) - 1):
        in_f = chans[i] * (2 if i > 0 else 1)   # i>0: concat(point_feats, voxel_feats_per_point)
        out_f = chans[i + 1]
        key, k1, k2, k3, k4, k5 = jax.random.split(key, 6)
        bound = 1.0 / np.sqrt(in_f)
        w = jax.random.uniform(k1, (in_f, out_f), jnp.float32, -bound, bound)
        gamma = 1.0 + 0.1 * jax.random.normal(k2, (out_f,), jnp.float32)
        beta = 0.1 * jax.random.normal(k3, (out_f,), jnp.float32)
        rmean = 0.1 * jax.random.normal(k4, (out_f,), jnp.float32)
        rvar = jnp.abs(1.0 + 0.1 * jax.random.normal(k5, (out_f,), jnp.float32))
        scale = gamma / jnp.sqrt(rvar + BN_EPS)        # fold BN (eval mode) into scale/shift
        shift = beta - rmean * scale
        params.append((w, scale.reshape(1, -1), shift.reshape(1, -1)))
    return params


# ---------------------------- pure-JAX reference (for correctness check) ----------------------------
def _reference_forward(features, coors, params, seg):
    onehot = (seg[None, :] == jnp.arange(V_MAX, dtype=jnp.int32)[:, None]).astype(jnp.float32)
    cnt = onehot.sum(axis=1, keepdims=True)
    vmean = (onehot @ features) / jnp.maximum(cnt, 1.0)
    pmean = onehot.T @ vmean
    cf = coors.astype(jnp.float32)
    f_center = jnp.stack(
        [features[:, 0] - (cf[:, 3] * VX + X_OFFSET),
         features[:, 1] - (cf[:, 2] * VY + Y_OFFSET),
         features[:, 2] - (cf[:, 1] * VZ + Z_OFFSET)], axis=1)
    dist = jnp.sqrt(jnp.sum(features[:, :3] ** 2, axis=1, keepdims=True))
    x = jnp.concatenate([features, features[:, :3] - pmean[:, :3], f_center, dist], axis=1)

    def scatter_max(y):
        masked = jnp.where(onehot[:, :, None] > 0, y[None, :, :], -jnp.inf)
        return jnp.where(cnt > 0, jnp.max(masked, axis=1), 0.0)

    voxel_feats = None
    for i, (w, s, b) in enumerate(params):
        y = jnp.maximum((x @ w) * s + b, 0.0)
        voxel_feats = scatter_max(y)
        if i != len(params) - 1:
            x = jnp.concatenate([y, onehot.T @ voxel_feats], axis=1)
    return voxel_feats


# ---------------------------- main ----------------------------
if __name__ == "__main__":
    key = jax.random.PRNGKey(0)
    kp, kx, ky, kz, ki = jax.random.split(key, 5)

    # points confined to an 8x8x1 voxel region per batch so voxels contain multiple points
    px = jax.random.uniform(kx, (N_POINTS,), jnp.float32, 0.0, 1.6)
    py = jax.random.uniform(ky, (N_POINTS,), jnp.float32, -40.0, -38.4)
    pz = jax.random.uniform(kz, (N_POINTS,), jnp.float32, -3.0, 0.99)
    inten = jax.random.uniform(ki, (N_POINTS,), jnp.float32)
    features = jnp.stack([px, py, pz, inten], axis=1)

    batch_idx = jnp.concatenate([jnp.zeros(N_POINTS // 2, jnp.int32),
                                 jnp.ones(N_POINTS - N_POINTS // 2, jnp.int32)])
    cx = jnp.clip(jnp.floor((px - PC_RANGE[0]) / VX).astype(jnp.int32), 0, CANVAS_X - 1)
    cy = jnp.clip(jnp.floor((py - PC_RANGE[1]) / VY).astype(jnp.int32), 0, CANVAS_Y - 1)
    cz = jnp.clip(jnp.floor((pz - PC_RANGE[2]) / VZ).astype(jnp.int32), 0, max(CANVAS_Z - 1, 0))
    coors = jnp.stack([batch_idx, cz, cy, cx], axis=1)              # (N, 4) = (b, z, y, x)

    params = init_params(kp)

    fwd = jax.jit(dynamic_vfe_forward)
    voxel_feats, voxel_coors, n_voxels = fwd(features, coors, params)
    jax.block_until_ready((voxel_feats, voxel_coors, n_voxels))

    assert voxel_feats.shape == (V_MAX, FEAT_CHANNELS[-1])
    assert voxel_coors.shape == (V_MAX, 4)

    # correctness check against a pure-JAX reference of the same (padded/sorted) semantics
    _, seg_ref = _voxel_bookkeeping(coors)
    ref_feats = _reference_forward(features, coors, params, seg_ref)
    np.testing.assert_allclose(np.asarray(voxel_feats), np.asarray(ref_feats),
                               rtol=1e-3, atol=1e-3)

    print("KERNEL_OK")
</pallas_src>

<mosaic_0001>
module attributes {stable_mosaic.version = 11 : i64} {
  func.func private @main(%arg0: i32) attributes {dimension_semantics = [#tpu.dimension_semantics<core_parallel>], iteration_bounds = array<i64: 2>, tpu.core_type = #tpu.core_type<sc_scalar_subcore>, window_params = []} {
    return
  }
}

module attributes {stable_mosaic.version = 11 : i64} {
  func.func private @main(%arg0: i32) attributes {dimension_semantics = [#tpu.dimension_semantics<core_parallel>], iteration_bounds = array<i64: 2>, tpu.core_type = #tpu.core_type<sc_scalar_subcore>, window_params = []} {
    return
  }
}

module attributes {stable_mosaic.version = 11 : i64} {
  func.func @_fused_vfe_kernel(%arg0: memref<1x256xi32, #tpu.memory_space<vmem>>, %arg1: memref<256x4xf32, #tpu.memory_space<vmem>>, %arg2: memref<4x256xf32, #tpu.memory_space<vmem>>, %arg3: memref<4x256xf32, #tpu.memory_space<vmem>>, %arg4: memref<16x11xf32, #tpu.memory_space<vmem>>, %arg5: memref<16x1xf32, #tpu.memory_space<vmem>>, %arg6: memref<16x1xf32, #tpu.memory_space<vmem>>, %arg7: memref<32x16xf32, #tpu.memory_space<vmem>>, %arg8: memref<32x16xf32, #tpu.memory_space<vmem>>, %arg9: memref<32x1xf32, #tpu.memory_space<vmem>>, %arg10: memref<32x1xf32, #tpu.memory_space<vmem>>, %arg11: memref<128x32xf32, #tpu.memory_space<vmem>>, %arg12: memref<128x256xf32, #tpu.memory_space<vmem>>, %arg13: memref<128x16xf32, #tpu.memory_space<vmem>>) attributes {dimension_semantics = [], scalar_prefetch = 0 : i64, scratch_operands = 2 : i64, tpu.core_type = #tpu.core_type<tc>} {
    %c0 = arith.constant 0 : index
    %c0_0 = arith.constant 0 : index
    %0 = vector.load %arg0[%c0, %c0_0] : memref<1x256xi32, #tpu.memory_space<vmem>>, vector<1x256xi32>
    %1 = tpu.iota {dimensions = array<i32: 0>} : vector<128x256xi32>
    %2 = vector.broadcast %0 : vector<1x256xi32> to vector<128x256xi32>
    %3 = arith.cmpi eq, %1, %2 : vector<128x256xi32>
    %4 = arith.extui %3 : vector<128x256xi1> to vector<128x256xi32>
    %5 = arith.sitofp %4 : vector<128x256xi32> to vector<128x256xf32>
    %c0_1 = arith.constant 0 : index
    %c0_2 = arith.constant 0 : index
    %6 = vector.load %arg12[%c0_1, %c0_2] : memref<128x256xf32, #tpu.memory_space<vmem>>, vector<128x256xf32>
    tpu.vector_store %arg12[%c0_1, %c0_2], %5 {strides = array<i32>} : memref<128x256xf32, #tpu.memory_space<vmem>>, vector<128x256xf32>,
    %c0_3 = arith.constant 0 : index
    %c0_4 = arith.constant 0 : index
    %7 = vector.load %arg12[%c0_3, %c0_4] : memref<128x256xf32, #tpu.memory_space<vmem>>, vector<128x256xf32>
    %cst = arith.constant dense<0.000000e+00> : vector<128xf32>
    %8 = vector.multi_reduction <add>, %7, %cst [1] : vector<128x256xf32> to vector<128xf32>
    %9 = vector.shape_cast %8 : vector<128xf32> to vector<128x1xf32>
    %c0_5 = arith.constant 0 : index
    %c0_6 = arith.constant 0 : index
    %10 = vector.load %arg2[%c0_5, %c0_6] : memref<4x256xf32, #tpu.memory_space<vmem>>, vector<4x256xf32>
    %c0_7 = arith.constant 0 : index
    %c0_8 = arith.constant 0 : index
    %11 = vector.load %arg1[%c0_7, %c0_8] : memref<256x4xf32, #tpu.memory_space<vmem>>, vector<256x4xf32>
    %cst_9 = arith.constant dense<0.000000e+00> : vector<128x4xf32>
    %12 = tpu.matmul %7, %11, %cst_9 {dimension_numbers = #tpu.dot_dimension_numbers<[1], [0], [0], [1], [0, 0, 1, 1], [], []>} : vector<128x256xf32>, vector<256x4xf32>, vector<128x4xf32> -> vector<128x4xf32>
    %cst_10 = arith.constant 1.000000e+00 : f32
    %13 = vector.broadcast %cst_10 : f32 to vector<128x1xf32>
    %14 = arith.maximumf %9, %13 : vector<128x1xf32>
    %15 = vector.broadcast %14 : vector<128x1xf32> to vector<128x4xf32>
    %16 = arith.divf %12, %15 : vector<128x4xf32>
    %17 = vector.extract_strided_slice %16 {offsets = [0, 0], sizes = [128, 3], strides = [1, 1]} : vector<128x4xf32> to vector<128x3xf32>
    %cst_11 = arith.constant dense<0.000000e+00> : vector<3x256xf32>
    %18 = tpu.matmul %17, %7, %cst_11 {dimension_numbers = #tpu.dot_dimension_numbers<[0], [0], [1], [1], [0, 1, 1, 1], [], []>} : vector<128x3xf32>, vector<128x256xf32>, vector<3x256xf32> -> vector<3x256xf32>
    %19 = vector.extract_strided_slice %10 {offsets = [0, 0], sizes = [3, 256], strides = [1, 1]} : vector<4x256xf32> to vector<3x256xf32>
    %20 = arith.subf %19, %18 : vector<3x256xf32>
    %c0_12 = arith.constant 0 : index
    %c0_13 = arith.constant 0 : index
    %21 = vector.load %arg4[%c0_12, %c0_13] : memref<16x11xf32, #tpu.memory_space<vmem>>, vector<16x11xf32>
    %22 = vector.extract_strided_slice %21 {offsets = [0, 0], sizes = [16, 4], strides = [1, 1]} : vector<16x11xf32> to vector<16x4xf32>
    %cst_14 = arith.constant dense<0.000000e+00> : vector<16x256xf32>
    %23 = tpu.matmul %22, %10, %cst_14 {dimension_numbers = #tpu.dot_dimension_numbers<[1], [0], [0], [1], [0, 0, 1, 1], [], []>} : vector<16x4xf32>, vector<4x256xf32>, vector<16x256xf32> -> vector<16x256xf32>
    %24 = vector.extract_strided_slice %21 {offsets = [0, 4], sizes = [16, 3], strides = [1, 1]} : vector<16x11xf32> to vector<16x3xf32>
    %cst_15 = arith.constant dense<0.000000e+00> : vector<16x256xf32>
    %25 = tpu.matmul %24, %20, %cst_15 {dimension_numbers = #tpu.dot_dimension_numbers<[1], [0], [0], [1], [0, 0, 1, 1], [], []>} : vector<16x3xf32>, vector<3x256xf32>, vector<16x256xf32> -> vector<16x256xf32>
    %26 = arith.addf %23, %25 : vector<16x256xf32>
    %27 = vector.extract_strided_slice %21 {offsets = [0, 7], sizes = [16, 4], strides = [1, 1]} : vector<16x11xf32> to vector<16x4xf32>
    %c0_16 = arith.constant 0 : index
    %c0_17 = arith.constant 0 : index
    %28 = vector.load %arg3[%c0_16, %c0_17] : memref<4x256xf32, #tpu.memory_space<vmem>>, vector<4x256xf32>
    %cst_18 = arith.constant dense<0.000000e+00> : vector<16x256xf32>
    %29 = tpu.matmul %27, %28, %cst_18 {dimension_numbers = #tpu.dot_dimension_numbers<[1], [0], [0], [1], [0, 0, 1, 1], [], []>} : vector<16x4xf32>, vector<4x256xf32>, vector<16x256xf32> -> vector<16x256xf32>
    %30 = arith.addf %26, %29 : vector<16x256xf32>
    %c0_19 = arith.constant 0 : index
    %c0_20 = arith.constant 0 : index
    %31 = vector.load %arg5[%c0_19, %c0_20] : memref<16x1xf32, #tpu.memory_space<vmem>>, vector<16x1xf32>
    %32 = vector.broadcast %31 : vector<16x1xf32> to vector<16x256xf32>
    %33 = arith.mulf %30, %32 : vector<16x256xf32>
    %c0_21 = arith.constant 0 : index
    %c0_22 = arith.constant 0 : index
    %34 = vector.load %arg6[%c0_21, %c0_22] : memref<16x1xf32, #tpu.memory_space<vmem>>, vector<16x1xf32>
    %35 = vector.broadcast %34 : vector<16x1xf32> to vector<16x256xf32>
    %36 = arith.addf %33, %35 : vector<16x256xf32>
    %cst_23 = arith.constant 0.000000e+00 : f32
    %37 = vector.broadcast %cst_23 : f32 to vector<16x256xf32>
    %38 = arith.maximumf %36, %37 : vector<16x256xf32>
    %c0_24 = arith.constant 0 : index
    %c0_25 = arith.constant 0 : index
    %39 = vector.load %arg12[%c0_24, %c0_25] : memref<128x256xf32, #tpu.memory_space<vmem>>, vector<128x256xf32>
    %40 = vector.extract_strided_slice %38 {offsets = [0, 0], sizes = [1, 256], strides = [1, 1]} : vector<16x256xf32> to vector<1x256xf32>
    %41 = vector.broadcast %40 : vector<1x256xf32> to vector<128x256xf32>
    %42 = arith.mulf %39, %41 : vector<128x256xf32>
    %cst_26 = arith.constant dense<0xFF800000> : vector<128xf32>
    %43 = vector.multi_reduction <maximumf>, %42, %cst_26 [1] : vector<128x256xf32> to vector<128xf32>
    %44 = vector.shape_cast %43 : vector<128xf32> to vector<128x1xf32>
    %c0_27 = arith.constant 0 : index
    %c0_28 = arith.constant 0 : index
    %45 = vector.load %arg13[%c0_27, %c0_28] : memref<128x16xf32, #tpu.memory_space<vmem>>, vector<128x1xf32>
    tpu.vector_store %arg13[%c0_27, %c0_28], %44 {strides = array<i32>} : memref<128x16xf32, #tpu.memory_space<vmem>>, vector<128x1xf32>,
    %c0_29 = arith.constant 0 : index
    %c0_30 = arith.constant 0 : index
    %46 = vector.load %arg12[%c0_29, %c0_30] : memref<128x256xf32, #tpu.memory_space<vmem>>, vector<128x256xf32>
    %47 = vector.extract_strided_slice %38 {offsets = [1, 0], sizes = [1, 256], strides = [1, 1]} : vector<16x256xf32> to vector<1x256xf32>
    %48 = vector.broadcast %47 : vector<1x256xf32> to vector<128x256xf32>
    %49 = arith.mulf %46, %48 : vector<128x256xf32>
    %cst_31 = arith.constant dense<0xFF800000> : vector<128xf32>
    %50 = vector.multi_reduction <maximumf>, %49, %cst_31 [1] : vector<128x256xf32> to vector<128xf32>
    %51 = vector.shape_cast %50 : vector<128xf32> to vector<128x1xf32>
    %c0_32 = arith.constant 0 : index
    %c1 = arith.constant 1 : index
    %52 = vector.load %arg13[%c0_32, %c1] : memref<128x16xf32, #tpu.memory_space<vmem>>, vector<128x1xf32>
    tpu.vector_store %arg13[%c0_32, %c1], %51 {strides = array<i32>} : memref<128x16xf32, #tpu.memory_space<vmem>>, vector<128x1xf32>,
    %c0_33 = arith.constant 0 : index
    %c0_34 = arith.constant 0 : index
    %53 = vector.load %arg12[%c0_33, %c0_34] : memref<128x256xf32, #tpu.memory_space<vmem>>, vector<128x256xf32>
    %54 = vector.extract_strided_slice %38 {offsets = [2, 0], sizes = [1, 256], strides = [1, 1]} : vector<16x256xf32> to vector<1x256xf32>
    %55 = vector.broadcast %54 : vector<1x256xf32> to vector<128x256xf32>
    %56 = arith.mulf %53, %55 : vector<128x256xf32>
    %cst_35 = arith.constant dense<0xFF800000> : vector<128xf32>
    %57 = vector.multi_reduction <maximumf>, %56, %cst_35 [1] : vector<128x256xf32> to vector<128xf32>
    %58 = vector.shape_cast %57 : vector<128xf32> to vector<128x1xf32>
    %c0_36 = arith.constant 0 : index
    %c2 = arith.constant 2 : index
    %59 = vector.load %arg13[%c0_36, %c2] : memref<128x16xf32, #tpu.memory_space<vmem>>, vector<128x1xf32>
    tpu.vector_store %arg13[%c0_36, %c2], %58 {strides = array<i32>} : memref<128x16xf32, #tpu.memory_space<vmem>>, vector<128x1xf32>,
    %c0_37 = arith.constant 0 : index
    %c0_38 = arith.constant 0 : index
    %60 = vector.load %arg12[%c0_37, %c0_38] : memref<128x256xf32, #tpu.memory_space<vmem>>, vector<128x256xf32>
    %61 = vector.extract_strided_slice %38 {offsets = [3, 0], sizes = [1, 256], strides = [1, 1]} : vector<16x256xf32> to vector<1x256xf32>
    %62 = vector.broadcast %61 : vector<1x256xf32> to vector<128x256xf32>
    %63 = arith.mulf %60, %62 : vector<128x256xf32>
    %cst_39 = arith.constant dense<0xFF800000> : vector<128xf32>
    %64 = vector.multi_reduction <maximumf>, %63, %cst_39 [1] : vector<128x256xf32> to vector<128xf32>
    %65 = vector.shape_cast %64 : vector<128xf32> to vector<128x1xf32>
    %c0_40 = arith.constant 0 : index
    %c3 = arith.constant 3 : index
    %66 = vector.load %arg13[%c0_40, %c3] : memref<128x16xf32, #tpu.memory_space<vmem>>, vector<128x1xf32>
    tpu.vector_store %arg13[%c0_40, %c3], %65 {strides = array<i32>} : memref<128x16xf32, #tpu.memory_space<vmem>>, vector<128x1xf32>,
    %c0_41 = arith.constant 0 : index
    %c0_42 = arith.constant 0 : index
    %67 = vector.load %arg12[%c0_41, %c0_42] : memref<128x256xf32, #tpu.memory_space<vmem>>, vector<128x256xf32>
    %68 = vector.extract_strided_slice %38 {offsets = [4, 0], sizes = [1, 256], strides = [1, 1]} : vector<16x256xf32> to vector<1x256xf32>
    %69 = vector.broadcast %68 : vector<1x256xf32> to vector<128x256xf32>
    %70 = arith.mulf %67, %69 : vector<128x256xf32>
    %cst_43 = arith.constant dense<0xFF800000> : vector<128xf32>
    %71 = vector.multi_reduction <maximumf>, %70, %cst_43 [1] : vector<128x256xf32> to vector<128xf32>
    %72 = vector.shape_cast %71 : vector<128xf32> to vector<128x1xf32>
    %c0_44 = arith.constant 0 : index
    %c4 = arith.constant 4 : index
    %73 = vector.load %arg13[%c0_44, %c4] : memref<128x16xf32, #tpu.memory_space<vmem>>, vector<128x1xf32>
    tpu.vector_store %arg13[%c0_44, %c4], %72 {strides = array<i32>} : memref<128x16xf32, #tpu.memory_space<vmem>>, vector<128x1xf32>,
    %c0_45 = arith.constant 0 : index
    %c0_46 = arith.constant 0 : index
    %74 = vector.load %arg12[%c0_45, %c0_46] : memref<128x256xf32, #tpu.memory_space<vmem>>, vector<128x256xf32>
    %75 = vector.extract_strided_slice %38 {offsets = [5, 0], sizes = [1, 256], strides = [1, 1]} : vector<16x256xf32> to vector<1x256xf32>
    %76 = vector.broadcast %75 : vector<1x256xf32> to vector<128x256xf32>
    %77 = arith.mulf %74, %76 : vector<128x256xf32>
    %cst_47 = arith.constant dense<0xFF800000> : vector<128xf32>
    %78 = vector.multi_reduction <maximumf>, %77, %cst_47 [1] : vector<128x256xf32> to vector<128xf32>
    %79 = vector.shape_cast %78 : vector<128xf32> to vector<128x1xf32>
    %c0_48 = arith.constant 0 : index
    %c5 = arith.constant 5 : index
    %80 = vector.load %arg13[%c0_48, %c5] : memref<128x16xf32, #tpu.memory_space<vmem>>, vector<128x1xf32>
    tpu.vector_store %arg13[%c0_48, %c5], %79 {strides = array<i32>} : memref<128x16xf32, #tpu.memory_space<vmem>>, vector<128x1xf32>,
    %c0_49 = arith.constant 0 : index
    %c0_50 = arith.constant 0 : index
    %81 = vector.load %arg12[%c0_49, %c0_50] : memref<128x256xf32, #tpu.memory_space<vmem>>, vector<128x256xf32>
    %82 = vector.extract_strided_slice %38 {offsets = [6, 0], sizes = [1, 256], strides = [1, 1]} : vector<16x256xf32> to vector<1x256xf32>
    %83 = vector.broadcast %82 : vector<1x256xf32> to vector<128x256xf32>
    %84 = arith.mulf %81, %83 : vector<128x256xf32>
    %cst_51 = arith.constant dense<0xFF800000> : vector<128xf32>
    %85 = vector.multi_reduction <maximumf>, %84, %cst_51 [1] : vector<128x256xf32> to vector<128xf32>
    %86 = vector.shape_cast %85 : vector<128xf32> to vector<128x1xf32>
    %c0_52 = arith.constant 0 : index
    %c6 = arith.constant 6 : index
    %87 = vector.load %arg13[%c0_52, %c6] : memref<128x16xf32, #tpu.memory_space<vmem>>, vector<128x1xf32>
    tpu.vector_store %arg13[%c0_52, %c6], %86 {strides = array<i32>} : memref<128x16xf32, #tpu.memory_space<vmem>>, vector<128x1xf32>,
    %c0_53 = arith.constant 0 : index
    %c0_54 = arith.constant 0 : index
    %88 = vector.load %arg12[%c0_53, %c0_54] : memref<128x256xf32, #tpu.memory_space<vmem>>, vector<128x256xf32>
    %89 = vector.extract_strided_slice %38 {offsets = [7, 0], sizes = [1, 256], strides = [1, 1]} : vector<16x256xf32> to vector<1x256xf32>
    %90 = vector.broadcast %89 : vector<1x256xf32> to vector<128x256xf32>
    %91 = arith.mulf %88, %90 : vector<128x256xf32>
    %cst_55 = arith.constant dense<0xFF800000> : vector<128xf32>
    %92 = vector.multi_reduction <maximumf>, %91, %cst_55 [1] : vector<128x256xf32> to vector<128xf32>
    %93 = vector.shape_cast %92 : vector<128xf32> to vector<128x1xf32>
    %c0_56 = arith.constant 0 : index
    %c7 = arith.constant 7 : index
    %94 = vector.load %arg13[%c0_56, %c7] : memref<128x16xf32, #tpu.memory_space<vmem>>, vector<128x1xf32>
    tpu.vector_store %arg13[%c0_56, %c7], %93 {strides = array<i32>} : memref<128x16xf32, #tpu.memory_space<vmem>>, vector<128x1xf32>,
    %c0_57 = arith.constant 0 : index
    %c0_58 = arith.constant 0 : index
    %95 = vector.load %arg12[%c0_57, %c0_58] : memref<128x256xf32, #tpu.memory_space<vmem>>, vector<128x256xf32>
    %96 = vector.extract_strided_slice %38 {offsets = [8, 0], sizes = [1, 256], strides = [1, 1]} : vector<16x256xf32> to vector<1x256xf32>
    %97 = vector.broadcast %96 : vector<1x256xf32> to vector<128x256xf32>
    %98 = arith.mulf %95, %97 : vector<128x256xf32>
    %cst_59 = arith.constant dense<0xFF800000> : vector<128xf32>
    %99 = vector.multi_reduction <maximumf>, %98, %cst_59 [1] : vector<128x256xf32> to vector<128xf32>
    %100 = vector.shape_cast %99 : vector<128xf32> to vector<128x1xf32>
    %c0_60 = arith.constant 0 : index
    %c8 = arith.constant 8 : index
    %101 = vector.load %arg13[%c0_60, %c8] : memref<128x16xf32, #tpu.memory_space<vmem>>, vector<128x1xf32>
    tpu.vector_store %arg13[%c0_60, %c8], %100 {strides = array<i32>} : memref<128x16xf32, #tpu.memory_space<vmem>>, vector<128x1xf32>,
    %c0_61 = arith.constant 0 : index
    %c0_62 = arith.constant 0 : index
    %102 = vector.load %arg12[%c0_61, %c0_62] : memref<128x256xf32, #tpu.memory_space<vmem>>, vector<128x256xf32>
    %103 = vector.extract_strided_slice %38 {offsets = [9, 0], sizes = [1, 256], strides = [1, 1]} : vector<16x256xf32> to vector<1x256xf32>
    %104 = vector.broadcast %103 : vector<1x256xf32> to vector<128x256xf32>
    %105 = arith.mulf %102, %104 : vector<128x256xf32>
    %cst_63 = arith.constant dense<0xFF800000> : vector<128xf32>
    %106 = vector.multi_reduction <maximumf>, %105, %cst_63 [1] : vector<128x256xf32> to vector<128xf32>
    %107 = vector.shape_cast %106 : vector<128xf32> to vector<128x1xf32>
    %c0_64 = arith.constant 0 : index
    %c9 = arith.constant 9 : index
    %108 = vector.load %arg13[%c0_64, %c9] : memref<128x16xf32, #tpu.memory_space<vmem>>, vector<128x1xf32>
    tpu.vector_store %arg13[%c0_64, %c9], %107 {strides = array<i32>} : memref<128x16xf32, #tpu.memory_space<vmem>>, vector<128x1xf32>,
    %c0_65 = arith.constant 0 : index
    %c0_66 = arith.constant 0 : index
    %109 = vector.load %arg12[%c0_65, %c0_66] : memref<128x256xf32, #tpu.memory_space<vmem>>, vector<128x256xf32>
    %110 = vector.extract_strided_slice %38 {offsets = [10, 0], sizes = [1, 256], strides = [1, 1]} : vector<16x256xf32> to vector<1x256xf32>
    %111 = vector.broadcast %110 : vector<1x256xf32> to vector<128x256xf32>
    %112 = arith.mulf %109, %111 : vector<128x256xf32>
    %cst_67 = arith.constant dense<0xFF800000> : vector<128xf32>
    %113 = vector.multi_reduction <maximumf>, %112, %cst_67 [1] : vector<128x256xf32> to vector<128xf32>
    %114 = vector.shape_cast %113 : vector<128xf32> to vector<128x1xf32>
    %c0_68 = arith.constant 0 : index
    %c10 = arith.constant 10 : index
    %115 = vector.load %arg13[%c0_68, %c10] : memref<128x16xf32, #tpu.memory_space<vmem>>, vector<128x1xf32>
    tpu.vector_store %arg13[%c0_68, %c10], %114 {strides = array<i32>} : memref<128x16xf32, #tpu.memory_space<vmem>>, vector<128x1xf32>,
    %c0_69 = arith.constant 0 : index
    %c0_70 = arith.constant 0 : index
    %116 = vector.load %arg12[%c0_69, %c0_70] : memref<128x256xf32, #tpu.memory_space<vmem>>, vector<128x256xf32>
    %117 = vector.extract_strided_slice %38 {offsets = [11, 0], sizes = [1, 256], strides = [1, 1]} : vector<16x256xf32> to vector<1x256xf32>
    %118 = vector.broadcast %117 : vector<1x256xf32> to vector<128x256xf32>
    %119 = arith.mulf %116, %118 : vector<128x256xf32>
    %cst_71 = arith.constant dense<0xFF800000> : vector<128xf32>
    %120 = vector.multi_reduction <maximumf>, %119, %cst_71 [1] : vector<128x256xf32> to vector<128xf32>
    %121 = vector.shape_cast %120 : vector<128xf32> to vector<128x1xf32>
    %c0_72 = arith.constant 0 : index
    %c11 = arith.constant 11 : index
    %122 = vector.load %arg13[%c0_72, %c11] : memref<128x16xf32, #tpu.memory_space<vmem>>, vector<128x1xf32>
    tpu.vector_store %arg13[%c0_72, %c11], %121 {strides = array<i32>} : memref<128x16xf32, #tpu.memory_space<vmem>>, vector<128x1xf32>,
    %c0_73 = arith.constant 0 : index
    %c0_74 = arith.constant 0 : index
    %123 = vector.load %arg12[%c0_73, %c0_74] : memref<128x256xf32, #tpu.memory_space<vmem>>, vector<128x256xf32>
    %124 = vector.extract_strided_slice %38 {offsets = [12, 0], sizes = [1, 256], strides = [1, 1]} : vector<16x256xf32> to vector<1x256xf32>
    %125 = vector.broadcast %124 : vector<1x256xf32> to vector<128x256xf32>
    %126 = arith.mulf %123, %125 : vector<128x256xf32>
    %cst_75 = arith.constant dense<0xFF800000> : vector<128xf32>
    %127 = vector.multi_reduction <maximumf>, %126, %cst_75 [1] : vector<128x256xf32> to vector<128xf32>
    %128 = vector.shape_cast %127 : vector<128xf32> to vector<128x1xf32>
    %c0_76 = arith.constant 0 : index
    %c12 = arith.constant 12 : index
    %129 = vector.load %arg13[%c0_76, %c12] : memref<128x16xf32, #tpu.memory_space<vmem>>, vector<128x1xf32>
    tpu.vector_store %arg13[%c0_76, %c12], %128 {strides = array<i32>} : memref<128x16xf32, #tpu.memory_space<vmem>>, vector<128x1xf32>,
    %c0_77 = arith.constant 0 : index
    %c0_78 = arith.constant 0 : index
    %130 = vector.load %arg12[%c0_77, %c0_78] : memref<128x256xf32, #tpu.memory_space<vmem>>, vector<128x256xf32>
    %131 = vector.extract_strided_slice %38 {offsets = [13, 0], sizes = [1, 256], strides = [1, 1]} : vector<16x256xf32> to vector<1x256xf32>
    %132 = vector.broadcast %131 : vector<1x256xf32> to vector<128x256xf32>
    %133 = arith.mulf %130, %132 : vector<128x256xf32>
    %cst_79 = arith.constant dense<0xFF800000> : vector<128xf32>
    %134 = vector.multi_reduction <maximumf>, %133, %cst_79 [1] : vector<128x256xf32> to vector<128xf32>
    %135 = vector.shape_cast %134 : vector<128xf32> to vector<128x1xf32>
    %c0_80 = arith.constant 0 : index
    %c13 = arith.constant 13 : index
    %136 = vector.load %arg13[%c0_80, %c13] : memref<128x16xf32, #tpu.memory_space<vmem>>, vector<128x1xf32>
    tpu.vector_store %arg13[%c0_80, %c13], %135 {strides = array<i32>} : memref<128x16xf32, #tpu.memory_space<vmem>>, vector<128x1xf32>,
    %c0_81 = arith.constant 0 : index
    %c0_82 = arith.constant 0 : index
    %137 = vector.load %arg12[%c0_81, %c0_82] : memref<128x256xf32, #tpu.memory_space<vmem>>, vector<128x256xf32>
    %138 = vector.extract_strided_slice %38 {offsets = [14, 0], sizes = [1, 256], strides = [1, 1]} : vector<16x256xf32> to vector<1x256xf32>
    %139 = vector.broadcast %138 : vector<1x256xf32> to vector<128x256xf32>
    %140 = arith.mulf %137, %139 : vector<128x256xf32>
    %cst_83 = arith.constant dense<0xFF800000> : vector<128xf32>
    %141 = vector.multi_reduction <maximumf>, %140, %cst_83 [1] : vector<128x256xf32> to vector<128xf32>
    %142 = vector.shape_cast %141 : vector<128xf32> to vector<128x1xf32>
    %c0_84 = arith.constant 0 : index
    %c14 = arith.constant 14 : index
    %143 = vector.load %arg13[%c0_84, %c14] : memref<128x16xf32, #tpu.memory_space<vmem>>, vector<128x1xf32>
    tpu.vector_store %arg13[%c0_84, %c14], %142 {strides = array<i32>} : memref<128x16xf32, #tpu.memory_space<vmem>>, vector<128x1xf32>,
    %c0_85 = arith.constant 0 : index
    %c0_86 = arith.constant 0 : index
    %144 = vector.load %arg12[%c0_85, %c0_86] : memref<128x256xf32, #tpu.memory_space<vmem>>, vector<128x256xf32>
    %145 = vector.extract_strided_slice %38 {offsets = [15, 0], sizes = [1, 256], strides = [1, 1]} : vector<16x256xf32> to vector<1x256xf32>
    %146 = vector.broadcast %145 : vector<1x256xf32> to vector<128x256xf32>
    %147 = arith.mulf %144, %146 : vector<128x256xf32>
    %cst_87 = arith.constant dense<0xFF800000> : vector<128xf32>
    %148 = vector.multi_reduction <maximumf>, %147, %cst_87 [1] : vector<128x256xf32> to vector<128xf32>
    %149 = vector.shape_cast %148 : vector<128xf32> to vector<128x1xf32>
    %c0_88 = arith.constant 0 : index
    %c15 = arith.constant 15 : index
    %150 = vector.load %arg13[%c0_88, %c15] : memref<128x16xf32, #tpu.memory_space<vmem>>, vector<128x1xf32>
    tpu.vector_store %arg13[%c0_88, %c15], %149 {strides = array<i32>} : memref<128x16xf32, #tpu.memory_space<vmem>>, vector<128x1xf32>,
    %c0_89 = arith.constant 0 : index
    %c0_90 = arith.constant 0 : index
    %151 = vector.load %arg13[%c0_89, %c0_90] : memref<128x16xf32, #tpu.memory_space<vmem>>, vector<128x16xf32>
    %c0_91 = arith.constant 0 : index
    %c0_92 = arith.constant 0 : index
    %152 = vector.load %arg12[%c0_91, %c0_92] : memref<128x256xf32, #tpu.memory_space<vmem>>, vector<128x256xf32>
    %cst_93 = arith.constant dense<0.000000e+00> : vector<16x256xf32>
    %153 = tpu.matmul %151, %152, %cst_93 {dimension_numbers = #tpu.dot_dimension_numbers<[0], [0], [1], [1], [0, 1, 1, 1], [], []>} : vector<128x16xf32>, vector<128x256xf32>, vector<16x256xf32> -> vector<16x256xf32>
    %c0_94 = arith.constant 0 : index
    %c0_95 = arith.constant 0 : index
    %154 = vector.load %arg7[%c0_94, %c0_95] : memref<32x16xf32, #tpu.memory_space<vmem>>, vector<32x16xf32>
    %cst_96 = arith.constant dense<0.000000e+00> : vector<32x256xf32>
    %155 = tpu.matmul %154, %38, %cst_96 {dimension_numbers = #tpu.dot_dimension_numbers<[1], [0], [0], [1], [0, 0, 1, 1], [], []>} : vector<32x16xf32>, vector<16x256xf32>, vector<32x256xf32> -> vector<32x256xf32>
    %c0_97 = arith.constant 0 : index
    %c0_98 = arith.constant 0 : index
    %156 = vector.load %arg8[%c0_97, %c0_98] : memref<32x16xf32, #tpu.memory_space<vmem>>, vector<32x16xf32>
    %cst_99 = arith.constant dense<0.000000e+00> : vector<32x256xf32>
    %157 = tpu.matmul %156, %153, %cst_99 {dimension_numbers = #tpu.dot_dimension_numbers<[1], [0], [0], [1], [0, 0, 1, 1], [], []>} : vector<32x16xf32>, vector<16x256xf32>, vector<32x256xf32> -> vector<32x256xf32>
    %158 = arith.addf %155, %157 : vector<32x256xf32>
    %c0_100 = arith.constant 0 : index
    %c0_101 = arith.constant 0 : index
    %159 = vector.load %arg9[%c0_100, %c0_101] : memref<32x1xf32, #tpu.memory_space<vmem>>, vector<32x1xf32>
    %160 = vector.broadcast %159 : vector<32x1xf32> to vector<32x256xf32>
    %161 = arith.mulf %158, %160 : vector<32x256xf32>
    %c0_102 = arith.constant 0 : index
    %c0_103 = arith.constant 0 : index
    %162 = vector.load %arg10[%c0_102, %c0_103] : memref<32x1xf32, #tpu.memory_space<vmem>>, vector<32x1xf32>
    %163 = vector.broadcast %162 : vector<32x1xf32> to vector<32x256xf32>
    %164 = arith.addf %161, %163 : vector<32x256xf32>
    %cst_104 = arith.constant 0.000000e+00 : f32
    %165 = vector.broadcast %cst_104 : f32 to vector<32x256xf32>
    %166 = arith.maximumf %164, %165 : vector<32x256xf32>
    %c0_105 = arith.constant 0 : index
    %c0_106 = arith.constant 0 : index
    %167 = vector.load %arg12[%c0_105, %c0_106] : memref<128x256xf32, #tpu.memory_space<vmem>>, vector<128x256xf32>
    %168 = vector.extract_strided_slice %166 {offsets = [0, 0], sizes = [1, 256], strides = [1, 1]} : vector<32x256xf32> to vector<1x256xf32>
    %169 = vector.broadcast %168 : vector<1x256xf32> to vector<128x256xf32>
    %170 = arith.mulf %167, %169 : vector<128x256xf32>
    %cst_107 = arith.constant dense<0xFF800000> : vector<128xf32>
    %171 = vector.multi_reduction <maximumf>, %170, %cst_107 [1] : vector<128x256xf32> to vector<128xf32>
    %172 = vector.shape_cast %171 : vector<128xf32> to vector<128x1xf32>
    %c0_108 = arith.constant 0 : index
    %c0_109 = arith.constant 0 : index
    %173 = vector.load %arg11[%c0_108, %c0_109] : memref<128x32xf32, #tpu.memory_space<vmem>>, vector<128x1xf32>
    tpu.vector_store %arg11[%c0_108, %c0_109], %172 {strides = array<i32>} : memref<128x32xf32, #tpu.memory_space<vmem>>, vector<128x1xf32>,
    %c0_110 = arith.constant 0 : index
    %c0_111 = arith.constant 0 : index
    %174 = vector.load %arg12[%c0_110, %c0_111] : memref<128x256xf32, #tpu.memory_space<vmem>>, vector<128x256xf32>
    %175 = vector.extract_strided_slice %166 {offsets = [1, 0], sizes = [1, 256], strides = [1, 1]} : vector<32x256xf32> to vector<1x256xf32>
    %176 = vector.broadcast %175 : vector<1x256xf32> to vector<128x256xf32>
    %177 = arith.mulf %174, %176 : vector<128x256xf32>
    %cst_112 = arith.constant dense<0xFF800000> : vector<128xf32>
    %178 = vector.multi_reduction <maximumf>, %177, %cst_112 [1] : vector<128x256xf32> to vector<128xf32>
    %179 = vector.shape_cast %178 : vector<128xf32> to vector<128x1xf32>
    %c0_113 = arith.constant 0 : index
    %c1_114 = arith.constant 1 : index
    %180 = vector.load %arg11[%c0_113, %c1_114] : memref<128x32xf32, #tpu.memory_space<vmem>>, vector<128x1xf32>
    tpu.vector_store %arg11[%c0_113, %c1_114], %179 {strides = array<i32>} : memref<128x32xf32, #tpu.memory_space<vmem>>, vector<128x1xf32>,
    %c0_115 = arith.constant 0 : index
    %c0_116 = arith.constant 0 : index
    %181 = vector.load %arg12[%c0_115, %c0_116] : memref<128x256xf32, #tpu.memory_space<vmem>>, vector<128x256xf32>
    %182 = vector.extract_strided_slice %166 {offsets = [2, 0], sizes = [1, 256], strides = [1, 1]} : vector<32x256xf32> to vector<1x256xf32>
    %183 = vector.broadcast %182 : vector<1x256xf32> to vector<128x256xf32>
    %184 = arith.mulf %181, %183 : vector<128x256xf32>
    %cst_117 = arith.constant dense<0xFF800000> : vector<128xf32>
    %185 = vector.multi_reduction <maximumf>, %184, %cst_117 [1] : vector<128x256xf32> to vector<128xf32>
    %186 = vector.shape_cast %185 : vector<128xf32> to vector<128x1xf32>
    %c0_118 = arith.constant 0 : index
    %c2_119 = arith.constant 2 : index
    %187 = vector.load %arg11[%c0_118, %c2_119] : memref<128x32xf32, #tpu.memory_space<vmem>>, vector<128x1xf32>
    tpu.vector_store %arg11[%c0_118, %c2_119], %186 {strides = array<i32>} : memref<128x32xf32, #tpu.memory_space<vmem>>, vector<128x1xf32>,
    %c0_120 = arith.constant 0 : index
    %c0_121 = arith.constant 0 : index
    %188 = vector.load %arg12[%c0_120, %c0_121] : memref<128x256xf32, #tpu.memory_space<vmem>>, vector<128x256xf32>
    %189 = vector.extract_strided_slice %166 {offsets = [3, 0], sizes = [1, 256], strides = [1, 1]} : vector<32x256xf32> to vector<1x256xf32>
    %190 = vector.broadcast %189 : vector<1x256xf32> to vector<128x256xf32>
    %191 = arith.mulf %188, %190 : vector<128x256xf32>
    %cst_122 = arith.constant dense<0xFF800000> : vector<128xf32>
    %192 = vector.multi_reduction <maximumf>, %191, %cst_122 [1] : vector<128x256xf32> to vector<128xf32>
    %193 = vector.shape_cast %192 : vector<128xf32> to vector<128x1xf32>
    %c0_123 = arith.constant 0 : index
    %c3_124 = arith.constant 3 : index
    %194 = vector.load %arg11[%c0_123, %c3_124] : memref<128x32xf32, #tpu.memory_space<vmem>>, vector<128x1xf32>
    tpu.vector_store %arg11[%c0_123, %c3_124], %193 {strides = array<i32>} : memref<128x32xf32, #tpu.memory_space<vmem>>, vector<128x1xf32>,
    %c0_125 = arith.constant 0 : index
    %c0_126 = arith.constant 0 : index
    %195 = vector.load %arg12[%c0_125, %c0_126] : memref<128x256xf32, #tpu.memory_space<vmem>>, vector<128x256xf32>
    %196 = vector.extract_strided_slice %166 {offsets = [4, 0], sizes = [1, 256], strides = [1, 1]} : vector<32x256xf32> to vector<1x256xf32>
    %197 = vector.broadcast %196 : vector<1x256xf32> to vector<128x256xf32>
    %198 = arith.mulf %195, %197 : vector<128x256xf32>
    %cst_127 = arith.constant dense<0xFF800000> : vector<128xf32>
    %199 = vector.multi_reduction <maximumf>, %198, %cst_127 [1] : vector<128x256xf32> to vector<128xf32>
    %200 = vector.shape_cast %199 : vector<128xf32> to vector<128x1xf32>
    %c0_128 = arith.constant 0 : index
    %c4_129 = arith.constant 4 : index
    %201 = vector.load %arg11[%c0_128, %c4_129] : memref<128x32xf32, #tpu.memory_space<vmem>>, vector<128x1xf32>
    tpu.vector_store %arg11[%c0_128, %c4_129], %200 {strides = array<i32>} : memref<128x32xf32, #tpu.memory_space<vmem>>, vector<128x1xf32>,
    %c0_130 = arith.constant 0 : index
    %c0_131 = arith.constant 0 : index
    %202 = vector.load %arg12[%c0_130, %c0_131] : memref<128x256xf32, #tpu.memory_space<vmem>>, vector<128x256xf32>
    %203 = vector.extract_strided_slice %166 {offsets = [5, 0], sizes = [1, 256], strides = [1, 1]} : vector<32x256xf32> to vector<1x256xf32>
    %204 = vector.broadcast %203 : vector<1x256xf32> to vector<128x256xf32>
    %205 = arith.mulf %202, %204 : vector<128x256xf32>
    %cst_132 = arith.constant dense<0xFF800000> : vector<128xf32>
    %206 = vector.multi_reduction <maximumf>, %205, %cst_132 [1] : vector<128x256xf32> to vector<128xf32>
    %207 = vector.shape_cast %206 : vector<128xf32> to vector<128x1xf32>
    %c0_133 = arith.constant 0 : index
    %c5_134 = arith.constant 5 : index
    %208 = vector.load %arg11[%c0_133, %c5_134] : memref<128x32xf32, #tpu.memory_space<vmem>>, vector<128x1xf32>
    tpu.vector_store %arg11[%c0_133, %c5_134], %207 {strides = array<i32>} : memref<128x32xf32, #tpu.memory_space<vmem>>, vector<128x1xf32>,
    %c0_135 = arith.constant 0 : index
    %c0_136 = arith.constant 0 : index
    %209 = vector.load %arg12[%c0_135, %c0_136] : memref<128x256xf32, #tpu.memory_space<vmem>>, vector<128x256xf32>
    %210 = vector.extract_strided_slice %166 {offsets = [6, 0], sizes = [1, 256], strides = [1, 1]} : vector<32x256xf32> to vector<1x256xf32>
    %211 = vector.broadcast %210 : vector<1x256xf32> to vector<128x256xf32>
    %212 = arith.mulf %209, %211 : vector<128x256xf32>
    %cst_137 = arith.constant dense<0xFF800000> : vector<128xf32>
    %213 = vector.multi_reduction <maximumf>, %212, %cst_137 [1] : vector<128x256xf32> to vector<128xf32>
    %214 = vector.shape_cast %213 : vector<128xf32> to vector<128x1xf32>
    %c0_138 = arith.constant 0 : index
    %c6_139 = arith.constant 6 : index
    %215 = vector.load %arg11[%c0_138, %c6_139] : memref<128x32xf32, #tpu.memory_space<vmem>>, vector<128x1xf32>
    tpu.vector_store %arg11[%c0_138, %c6_139], %214 {strides = array<i32>} : memref<128x32xf32, #tpu.memory_space<vmem>>, vector<128x1xf32>,
    %c0_140 = arith.constant 0 : index
    %c0_141 = arith.constant 0 : index
    %216 = vector.load %arg12[%c0_140, %c0_141] : memref<128x256xf32, #tpu.memory_space<vmem>>, vector<128x256xf32>
    %217 = vector.extract_strided_slice %166 {offsets = [7, 0], sizes = [1, 256], strides = [1, 1]} : vector<32x256xf32> to vector<1x256xf32>
    %218 = vector.broadcast %217 : vector<1x256xf32> to vector<128x256xf32>
    %219 = arith.mulf %216, %218 : vector<128x256xf32>
    %cst_142 = arith.constant dense<0xFF800000> : vector<128xf32>
    %220 = vector.multi_reduction <maximumf>, %219, %cst_142 [1] : vector<128x256xf32> to vector<128xf32>
    %221 = vector.shape_cast %220 : vector<128xf32> to vector<128x1xf32>
    %c0_143 = arith.constant 0 : index
    %c7_144 = arith.constant 7 : index
    %222 = vector.load %arg11[%c0_143, %c7_144] : memref<128x32xf32, #tpu.memory_space<vmem>>, vector<128x1xf32>
    tpu.vector_store %arg11[%c0_143, %c7_144], %221 {strides = array<i32>} : memref<128x32xf32, #tpu.memory_space<vmem>>, vector<128x1xf32>,
    %c0_145 = arith.constant 0 : index
    %c0_146 = arith.constant 0 : index
    %223 = vector.load %arg12[%c0_145, %c0_146] : memref<128x256xf32, #tpu.memory_space<vmem>>, vector<128x256xf32>
    %224 = vector.extract_strided_slice %166 {offsets = [8, 0], sizes = [1, 256], strides = [1, 1]} : vector<32x256xf32> to vector<1x256xf32>
    %225 = vector.broadcast %224 : vector<1x256xf32> to vector<128x256xf32>
    %226 = arith.mulf %223, %225 : vector<128x256xf32>
    %cst_147 = arith.constant dense<0xFF800000> : vector<128xf32>
    %227 = vector.multi_reduction <maximumf>, %226, %cst_147 [1] : vector<128x256xf32> to vector<128xf32>
    %228 = vector.shape_cast %227 : vector<128xf32> to vector<128x1xf32>
    %c0_148 = arith.constant 0 : index
    %c8_149 = arith.constant 8 : index
    %229 = vector.load %arg11[%c0_148, %c8_149] : memref<128x32xf32, #tpu.memory_space<vmem>>, vector<128x1xf32>
    tpu.vector_store %arg11[%c0_148, %c8_149], %228 {strides = array<i32>} : memref<128x32xf32, #tpu.memory_space<vmem>>, vector<128x1xf32>,
    %c0_150 = arith.constant 0 : index
    %c0_151 = arith.constant 0 : index
    %230 = vector.load %arg12[%c0_150, %c0_151] : memref<128x256xf32, #tpu.memory_space<vmem>>, vector<128x256xf32>
    %231 = vector.extract_strided_slice %166 {offsets = [9, 0], sizes = [1, 256], strides = [1, 1]} : vector<32x256xf32> to vector<1x256xf32>
    %232 = vector.broadcast %231 : vector<1x256xf32> to vector<128x256xf32>
    %233 = arith.mulf %230, %232 : vector<128x256xf32>
    %cst_152 = arith.constant dense<0xFF800000> : vector<128xf32>
    %234 = vector.multi_reduction <maximumf>, %233, %cst_152 [1] : vector<128x256xf32> to vector<128xf32>
    %235 = vector.shape_cast %234 : vector<128xf32> to vector<128x1xf32>
    %c0_153 = arith.constant 0 : index
    %c9_154 = arith.constant 9 : index
    %236 = vector.load %arg11[%c0_153, %c9_154] : memref<128x32xf32, #tpu.memory_space<vmem>>, vector<128x1xf32>
    tpu.vector_store %arg11[%c0_153, %c9_154], %235 {strides = array<i32>} : memref<128x32xf32, #tpu.memory_space<vmem>>, vector<128x1xf32>,
    %c0_155 = arith.constant 0 : index
    %c0_156 = arith.constant 0 : index
    %237 = vector.load %arg12[%c0_155, %c0_156] : memref<128x256xf32, #tpu.memory_space<vmem>>, vector<128x256xf32>
    %238 = vector.extract_strided_slice %166 {offsets = [10, 0], sizes = [1, 256], strides = [1, 1]} : vector<32x256xf32> to vector<1x256xf32>
    %239 = vector.broadcast %238 : vector<1x256xf32> to vector<128x256xf32>
    %240 = arith.mulf %237, %239 : vector<128x256xf32>
    %cst_157 = arith.constant dense<0xFF800000> : vector<128xf32>
    %241 = vector.multi_reduction <maximumf>, %240, %cst_157 [1] : vector<128x256xf32> to vector<128xf32>
    %242 = vector.shape_cast %241 : vector<128xf32> to vector<128x1xf32>
    %c0_158 = arith.constant 0 : index
    %c10_159 = arith.constant 10 : index
    %243 = vector.load %arg11[%c0_158, %c10_159] : memref<128x32xf32, #tpu.memory_space<vmem>>, vector<128x1xf32>
    tpu.vector_store %arg11[%c0_158, %c10_159], %242 {strides = array<i32>} : memref<128x32xf32, #tpu.memory_space<vmem>>, vector<128x1xf32>,
    %c0_160 = arith.constant 0 : index
    %c0_161 = arith.constant 0 : index
    %244 = vector.load %arg12[%c0_160, %c0_161] : memref<128x256xf32, #tpu.memory_space<vmem>>, vector<128x256xf32>
    %245 = vector.extract_strided_slice %166 {offsets = [11, 0], sizes = [1, 256], strides = [1, 1]} : vector<32x256xf32> to vector<1x256xf32>
    %246 = vector.broadcast %245 : vector<1x256xf32> to vector<128x256xf32>
    %247 = arith.mulf %244, %246 : vector<128x256xf32>
    %cst_162 = arith.constant dense<0xFF800000> : vector<128xf32>
    %248 = vector.multi_reduction <maximumf>, %247, %cst_162 [1] : vector<128x256xf32> to vector<128xf32>
    %249 = vector.shape_cast %248 : vector<128xf32> to vector<128x1xf32>
    %c0_163 = arith.constant 0 : index
    %c11_164 = arith.constant 11 : index
    %250 = vector.load %arg11[%c0_163, %c11_164] : memref<128x32xf32, #tpu.memory_space<vmem>>, vector<128x1xf32>
    tpu.vector_store %arg11[%c0_163, %c11_164], %249 {strides = array<i32>} : memref<128x32xf32, #tpu.memory_space<vmem>>, vector<128x1xf32>,
    %c0_165 = arith.constant 0 : index
    %c0_166 = arith.constant 0 : index
    %251 = vector.load %arg12[%c0_165, %c0_166] : memref<128x256xf32, #tpu.memory_space<vmem>>, vector<128x256xf32>
    %252 = vector.extract_strided_slice %166 {offsets = [12, 0], sizes = [1, 256], strides = [1, 1]} : vector<32x256xf32> to vector<1x256xf32>
    %253 = vector.broadcast %252 : vector<1x256xf32> to vector<128x256xf32>
    %254 = arith.mulf %251, %253 : vector<128x256xf32>
    %cst_167 = arith.constant dense<0xFF800000> : vector<128xf32>
    %255 = vector.multi_reduction <maximumf>, %254, %cst_167 [1] : vector<128x256xf32> to vector<128xf32>
    %256 = vector.shape_cast %255 : vector<128xf32> to vector<128x1xf32>
    %c0_168 = arith.constant 0 : index
    %c12_169 = arith.constant 12 : index
    %257 = vector.load %arg11[%c0_168, %c12_169] : memref<128x32xf32, #tpu.memory_space<vmem>>, vector<128x1xf32>
    tpu.vector_store %arg11[%c0_168, %c12_169], %256 {strides = array<i32>} : memref<128x32xf32, #tpu.memory_space<vmem>>, vector<128x1xf32>,
    %c0_170 = arith.constant 0 : index
    %c0_171 = arith.constant 0 : index
    %258 = vector.load %arg12[%c0_170, %c0_171] : memref<128x256xf32, #tpu.memory_space<vmem>>, vector<128x256xf32>
    %259 = vector.extract_strided_slice %166 {offsets = [13, 0], sizes = [1, 256], strides = [1, 1]} : vector<32x256xf32> to vector<1x256xf32>
    %260 = vector.broadcast %259 : vector<1x256xf32> to vector<128x256xf32>
    %261 = arith.mulf %258, %260 : vector<128x256xf32>
    %cst_172 = arith.constant dense<0xFF800000> : vector<128xf32>
    %262 = vector.multi_reduction <maximumf>, %261, %cst_172 [1] : vector<128x256xf32> to vector<128xf32>
    %263 = vector.shape_cast %262 : vector<128xf32> to vector<128x1xf32>
    %c0_173 = arith.constant 0 : index
    %c13_174 = arith.constant 13 : index
    %264 = vector.load %arg11[%c0_173, %c13_174] : memref<128x32xf32, #tpu.memory_space<vmem>>, vector<128x1xf32>
    tpu.vector_store %arg11[%c0_173, %c13_174], %263 {strides = array<i32>} : memref<128x32xf32, #tpu.memory_space<vmem>>, vector<128x1xf32>,
    %c0_175 = arith.constant 0 : index
    %c0_176 = arith.constant 0 : index
    %265 = vector.load %arg12[%c0_175, %c0_176] : memref<128x256xf32, #tpu.memory_space<vmem>>, vector<128x256xf32>
    %266 = vector.extract_strided_slice %166 {offsets = [14, 0], sizes = [1, 256], strides = [1, 1]} : vector<32x256xf32> to vector<1x256xf32>
    %267 = vector.broadcast %266 : vector<1x256xf32> to vector<128x256xf32>
    %268 = arith.mulf %265, %267 : vector<128x256xf32>
    %cst_177 = arith.constant dense<0xFF800000> : vector<128xf32>
    %269 = vector.multi_reduction <maximumf>, %268, %cst_177 [1] : vector<128x256xf32> to vector<128xf32>
    %270 = vector.shape_cast %269 : vector<128xf32> to vector<128x1xf32>
    %c0_178 = arith.constant 0 : index
    %c14_179 = arith.constant 14 : index
    %271 = vector.load %arg11[%c0_178, %c14_179] : memref<128x32xf32, #tpu.memory_space<vmem>>, vector<128x1xf32>
    tpu.vector_store %arg11[%c0_178, %c14_179], %270 {strides = array<i32>} : memref<128x32xf32, #tpu.memory_space<vmem>>, vector<128x1xf32>,
    %c0_180 = arith.constant 0 : index
    %c0_181 = arith.constant 0 : index
    %272 = vector.load %arg12[%c0_180, %c0_181] : memref<128x256xf32, #tpu.memory_space<vmem>>, vector<128x256xf32>
    %273 = vector.extract_strided_slice %166 {offsets = [15, 0], sizes = [1, 256], strides = [1, 1]} : vector<32x256xf32> to vector<1x256xf32>
    %274 = vector.broadcast %273 : vector<1x256xf32> to vector<128x256xf32>
    %275 = arith.mulf %272, %274 : vector<128x256xf32>
    %cst_182 = arith.constant dense<0xFF800000> : vector<128xf32>
    %276 = vector.multi_reduction <maximumf>, %275, %cst_182 [1] : vector<128x256xf32> to vector<128xf32>
    %277 = vector.shape_cast %276 : vector<128xf32> to vector<128x1xf32>
    %c0_183 = arith.constant 0 : index
    %c15_184 = arith.constant 15 : index
    %278 = vector.load %arg11[%c0_183, %c15_184] : memref<128x32xf32, #tpu.memory_space<vmem>>, vector<128x1xf32>
    tpu.vector_store %arg11[%c0_183, %c15_184], %277 {strides = array<i32>} : memref<128x32xf32, #tpu.memory_space<vmem>>, vector<128x1xf32>,
    %c0_185 = arith.constant 0 : index
    %c0_186 = arith.constant 0 : index
    %279 = vector.load %arg12[%c0_185, %c0_186] : memref<128x256xf32, #tpu.memory_space<vmem>>, vector<128x256xf32>
    %280 = vector.extract_strided_slice %166 {offsets = [16, 0], sizes = [1, 256], strides = [1, 1]} : vector<32x256xf32> to vector<1x256xf32>
    %281 = vector.broadcast %280 : vector<1x256xf32> to vector<128x256xf32>
    %282 = arith.mulf %279, %281 : vector<128x256xf32>
    %cst_187 = arith.constant dense<0xFF800000> : vector<128xf32>
    %283 = vector.multi_reduction <maximumf>, %282, %cst_187 [1] : vector<128x256xf32> to vector<128xf32>
    %284 = vector.shape_cast %283 : vector<128xf32> to vector<128x1xf32>
    %c0_188 = arith.constant 0 : index
    %c16 = arith.constant 16 : index
    %285 = vector.load %arg11[%c0_188, %c16] : memref<128x32xf32, #tpu.memory_space<vmem>>, vector<128x1xf32>
    tpu.vector_store %arg11[%c0_188, %c16], %284 {strides = array<i32>} : memref<128x32xf32, #tpu.memory_space<vmem>>, vector<128x1xf32>,
    %c0_189 = arith.constant 0 : index
    %c0_190 = arith.constant 0 : index
    %286 = vector.load %arg12[%c0_189, %c0_190] : memref<128x256xf32, #tpu.memory_space<vmem>>, vector<128x256xf32>
    %287 = vector.extract_strided_slice %166 {offsets = [17, 0], sizes = [1, 256], strides = [1, 1]} : vector<32x256xf32> to vector<1x256xf32>
    %288 = vector.broadcast %287 : vector<1x256xf32> to vector<128x256xf32>
    %289 = arith.mulf %286, %288 : vector<128x256xf32>
    %cst_191 = arith.constant dense<0xFF800000> : vector<128xf32>
    %290 = vector.multi_reduction <maximumf>, %289, %cst_191 [1] : vector<128x256xf32> to vector<128xf32>
    %291 = vector.shape_cast %290 : vector<128xf32> to vector<128x1xf32>
    %c0_192 = arith.constant 0 : index
    %c17 = arith.constant 17 : index
    %292 = vector.load %arg11[%c0_192, %c17] : memref<128x32xf32, #tpu.memory_space<vmem>>, vector<128x1xf32>
    tpu.vector_store %arg11[%c0_192, %c17], %291 {strides = array<i32>} : memref<128x32xf32, #tpu.memory_space<vmem>>, vector<128x1xf32>,
    %c0_193 = arith.constant 0 : index
    %c0_194 = arith.constant 0 : index
    %293 = vector.load %arg12[%c0_193, %c0_194] : memref<128x256xf32, #tpu.memory_space<vmem>>, vector<128x256xf32>
    %294 = vector.extract_strided_slice %166 {offsets = [18, 0], sizes = [1, 256], strides = [1, 1]} : vector<32x256xf32> to vector<1x256xf32>
    %295 = vector.broadcast %294 : vector<1x256xf32> to vector<128x256xf32>
    %296 = arith.mulf %293, %295 : vector<128x256xf32>
    %cst_195 = arith.constant dense<0xFF800000> : vector<128xf32>
    %297 = vector.multi_reduction <maximumf>, %296, %cst_195 [1] : vector<128x256xf32> to vector<128xf32>
    %298 = vector.shape_cast %297 : vector<128xf32> to vector<128x1xf32>
    %c0_196 = arith.constant 0 : index
    %c18 = arith.constant 18 : index
    %299 = vector.load %arg11[%c0_196, %c18] : memref<128x32xf32, #tpu.memory_space<vmem>>, vector<128x1xf32>
    tpu.vector_store %arg11[%c0_196, %c18], %298 {strides = array<i32>} : memref<128x32xf32, #tpu.memory_space<vmem>>, vector<128x1xf32>,
    %c0_197 = arith.constant 0 : index
    %c0_198 = arith.constant 0 : index
    %300 = vector.load %arg12[%c0_197, %c0_198] : memref<128x256xf32, #tpu.memory_space<vmem>>, vector<128x256xf32>
    %301 = vector.extract_strided_slice %166 {offsets = [19, 0], sizes = [1, 256], strides = [1, 1]} : vector<32x256xf32> to vector<1x256xf32>
    %302 = vector.broadcast %301 : vector<1x256xf32> to vector<128x256xf32>
    %303 = arith.mulf %300, %302 : vector<128x256xf32>
    %cst_199 = arith.constant dense<0xFF800000> : vector<128xf32>
    %304 = vector.multi_reduction <maximumf>, %303, %cst_199 [1] : vector<128x256xf32> to vector<128xf32>
    %305 = vector.shape_cast %304 : vector<128xf32> to vector<128x1xf32>
    %c0_200 = arith.constant 0 : index
    %c19 = arith.constant 19 : index
    %306 = vector.load %arg11[%c0_200, %c19] : memref<128x32xf32, #tpu.memory_space<vmem>>, vector<128x1xf32>
    tpu.vector_store %arg11[%c0_200, %c19], %305 {strides = array<i32>} : memref<128x32xf32, #tpu.memory_space<vmem>>, vector<128x1xf32>,
    %c0_201 = arith.constant 0 : index
    %c0_202 = arith.constant 0 : index
    %307 = vector.load %arg12[%c0_201, %c0_202] : memref<128x256xf32, #tpu.memory_space<vmem>>, vector<128x256xf32>
    %308 = vector.extract_strided_slice %166 {offsets = [20, 0], sizes = [1, 256], strides = [1, 1]} : vector<32x256xf32> to vector<1x256xf32>
    %309 = vector.broadcast %308 : vector<1x256xf32> to vector<128x256xf32>
    %310 = arith.mulf %307, %309 : vector<128x256xf32>
    %cst_203 = arith.constant dense<0xFF800000> : vector<128xf32>
    %311 = vector.multi_reduction <maximumf>, %310, %cst_203 [1] : vector<128x256xf32> to vector<128xf32>
    %312 = vector.shape_cast %311 : vector<128xf32> to vector<128x1xf32>
    %c0_204 = arith.constant 0 : index
    %c20 = arith.constant 20 : index
    %313 = vector.load %arg11[%c0_204, %c20] : memref<128x32xf32, #tpu.memory_space<vmem>>, vector<128x1xf32>
    tpu.vector_store %arg11[%c0_204, %c20], %312 {strides = array<i32>} : memref<128x32xf32, #tpu.memory_space<vmem>>, vector<128x1xf32>,
    %c0_205 = arith.constant 0 : index
    %c0_206 = arith.constant 0 : index
    %314 = vector.load %arg12[%c0_205, %c0_206] : memref<128x256xf32, #tpu.memory_space<vmem>>, vector<128x256xf32>
    %315 = vector.extract_strided_slice %166 {offsets = [21, 0], sizes = [1, 256], strides = [1, 1]} : vector<32x256xf32> to vector<1x256xf32>
    %316 = vector.broadcast %315 : vector<1x256xf32> to vector<128x256xf32>
    %317 = arith.mulf %314, %316 : vector<128x256xf32>
    %cst_207 = arith.constant dense<0xFF800000> : vector<128xf32>
    %318 = vector.multi_reduction <maximumf>, %317, %cst_207 [1] : vector<128x256xf32> to vector<128xf32>
    %319 = vector.shape_cast %318 : vector<128xf32> to vector<128x1xf32>
    %c0_208 = arith.constant 0 : index
    %c21 = arith.constant 21 : index
    %320 = vector.load %arg11[%c0_208, %c21] : memref<128x32xf32, #tpu.memory_space<vmem>>, vector<128x1xf32>
    tpu.vector_store %arg11[%c0_208, %c21], %319 {strides = array<i32>} : memref<128x32xf32, #tpu.memory_space<vmem>>, vector<128x1xf32>,
    %c0_209 = arith.constant 0 : index
    %c0_210 = arith.constant 0 : index
    %321 = vector.load %arg12[%c0_209, %c0_210] : memref<128x256xf32, #tpu.memory_space<vmem>>, vector<128x256xf32>
    %322 = vector.extract_strided_slice %166 {offsets = [22, 0], sizes = [1, 256], strides = [1, 1]} : vector<32x256xf32> to vector<1x256xf32>
    %323 = vector.broadcast %322 : vector<1x256xf32> to vector<128x256xf32>
    %324 = arith.mulf %321, %323 : vector<128x256xf32>
    %cst_211 = arith.constant dense<0xFF800000> : vector<128xf32>
    %325 = vector.multi_reduction <maximumf>, %324, %cst_211 [1] : vector<128x256xf32> to vector<128xf32>
    %326 = vector.shape_cast %325 : vector<128xf32> to vector<128x1xf32>
    %c0_212 = arith.constant 0 : index
    %c22 = arith.constant 22 : index
    %327 = vector.load %arg11[%c0_212, %c22] : memref<128x32xf32, #tpu.memory_space<vmem>>, vector<128x1xf32>
    tpu.vector_store %arg11[%c0_212, %c22], %326 {strides = array<i32>} : memref<128x32xf32, #tpu.memory_space<vmem>>, vector<128x1xf32>,
    %c0_213 = arith.constant 0 : index
    %c0_214 = arith.constant 0 : index
    %328 = vector.load %arg12[%c0_213, %c0_214] : memref<128x256xf32, #tpu.memory_space<vmem>>, vector<128x256xf32>
    %329 = vector.extract_strided_slice %166 {offsets = [23, 0], sizes = [1, 256], strides = [1, 1]} : vector<32x256xf32> to vector<1x256xf32>
    %330 = vector.broadcast %329 : vector<1x256xf32> to vector<128x256xf32>
    %331 = arith.mulf %328, %330 : vector<128x256xf32>
    %cst_215 = arith.constant dense<0xFF800000> : vector<128xf32>
    %332 = vector.multi_reduction <maximumf>, %331, %cst_215 [1] : vector<128x256xf32> to vector<128xf32>
    %333 = vector.shape_cast %332 : vector<128xf32> to vector<128x1xf32>
    %c0_216 = arith.constant 0 : index
    %c23 = arith.constant 23 : index
    %334 = vector.load %arg11[%c0_216, %c23] : memref<128x32xf32, #tpu.memory_space<vmem>>, vector<128x1xf32>
    tpu.vector_store %arg11[%c0_216, %c23], %333 {strides = array<i32>} : memref<128x32xf32, #tpu.memory_space<vmem>>, vector<128x1xf32>,
    %c0_217 = arith.constant 0 : index
    %c0_218 = arith.constant 0 : index
    %335 = vector.load %arg12[%c0_217, %c0_218] : memref<128x256xf32, #tpu.memory_space<vmem>>, vector<128x256xf32>
    %336 = vector.extract_strided_slice %166 {offsets = [24, 0], sizes = [1, 256], strides = [1, 1]} : vector<32x256xf32> to vector<1x256xf32>
    %337 = vector.broadcast %336 : vector<1x256xf32> to vector<128x256xf32>
    %338 = arith.mulf %335, %337 : vector<128x256xf32>
    %cst_219 = arith.constant dense<0xFF800000> : vector<128xf32>
    %339 = vector.multi_reduction <maximumf>, %338, %cst_219 [1] : vector<128x256xf32> to vector<128xf32>
    %340 = vector.shape_cast %339 : vector<128xf32> to vector<128x1xf32>
    %c0_220 = arith.constant 0 : index
    %c24 = arith.constant 24 : index
    %341 = vector.load %arg11[%c0_220, %c24] : memref<128x32xf32, #tpu.memory_space<vmem>>, vector<128x1xf32>
    tpu.vector_store %arg11[%c0_220, %c24], %340 {strides = array<i32>} : memref<128x32xf32, #tpu.memory_space<vmem>>, vector<128x1xf32>,
    %c0_221 = arith.constant 0 : index
    %c0_222 = arith.constant 0 : index
    %342 = vector.load %arg12[%c0_221, %c0_222] : memref<128x256xf32, #tpu.memory_space<vmem>>, vector<128x256xf32>
    %343 = vector.extract_strided_slice %166 {offsets = [25, 0], sizes = [1, 256], strides = [1, 1]} : vector<32x256xf32> to vector<1x256xf32>
    %344 = vector.broadcast %343 : vector<1x256xf32> to vector<128x256xf32>
    %345 = arith.mulf %342, %344 : vector<128x256xf32>
    %cst_223 = arith.constant dense<0xFF800000> : vector<128xf32>
    %346 = vector.multi_reduction <maximumf>, %345, %cst_223 [1] : vector<128x256xf32> to vector<128xf32>
    %347 = vector.shape_cast %346 : vector<128xf32> to vector<128x1xf32>
    %c0_224 = arith.constant 0 : index
    %c25 = arith.constant 25 : index
    %348 = vector.load %arg11[%c0_224, %c25] : memref<128x32xf32, #tpu.memory_space<vmem>>, vector<128x1xf32>
    tpu.vector_store %arg11[%c0_224, %c25], %347 {strides = array<i32>} : memref<128x32xf32, #tpu.memory_space<vmem>>, vector<128x1xf32>,
    %c0_225 = arith.constant 0 : index
    %c0_226 = arith.constant 0 : index
    %349 = vector.load %arg12[%c0_225, %c0_226] : memref<128x256xf32, #tpu.memory_space<vmem>>, vector<128x256xf32>
    %350 = vector.extract_strided_slice %166 {offsets = [26, 0], sizes = [1, 256], strides = [1, 1]} : vector<32x256xf32> to vector<1x256xf32>
    %351 = vector.broadcast %350 : vector<1x256xf32> to vector<128x256xf32>
    %352 = arith.mulf %349, %351 : vector<128x256xf32>
    %cst_227 = arith.constant dense<0xFF800000> : vector<128xf32>
    %353 = vector.multi_reduction <maximumf>, %352, %cst_227 [1] : vector<128x256xf32> to vector<128xf32>
    %354 = vector.shape_cast %353 : vector<128xf32> to vector<128x1xf32>
    %c0_228 = arith.constant 0 : index
    %c26 = arith.constant 26 : index
    %355 = vector.load %arg11[%c0_228, %c26] : memref<128x32xf32, #tpu.memory_space<vmem>>, vector<128x1xf32>
    tpu.vector_store %arg11[%c0_228, %c26], %354 {strides = array<i32>} : memref<128x32xf32, #tpu.memory_space<vmem>>, vector<128x1xf32>,
    %c0_229 = arith.constant 0 : index
    %c0_230 = arith.constant 0 : index
    %356 = vector.load %arg12[%c0_229, %c0_230] : memref<128x256xf32, #tpu.memory_space<vmem>>, vector<128x256xf32>
    %357 = vector.extract_strided_slice %166 {offsets = [27, 0], sizes = [1, 256], strides = [1, 1]} : vector<32x256xf32> to vector<1x256xf32>
    %358 = vector.broadcast %357 : vector<1x256xf32> to vector<128x256xf32>
    %359 = arith.mulf %356, %358 : vector<128x256xf32>
    %cst_231 = arith.constant dense<0xFF800000> : vector<128xf32>
    %360 = vector.multi_reduction <maximumf>, %359, %cst_231 [1] : vector<128x256xf32> to vector<128xf32>
    %361 = vector.shape_cast %360 : vector<128xf32> to vector<128x1xf32>
    %c0_232 = arith.constant 0 : index
    %c27 = arith.constant 27 : index
    %362 = vector.load %arg11[%c0_232, %c27] : memref<128x32xf32, #tpu.memory_space<vmem>>, vector<128x1xf32>
    tpu.vector_store %arg11[%c0_232, %c27], %361 {strides = array<i32>} : memref<128x32xf32, #tpu.memory_space<vmem>>, vector<128x1xf32>,
    %c0_233 = arith.constant 0 : index
    %c0_234 = arith.constant 0 : index
    %363 = vector.load %arg12[%c0_233, %c0_234] : memref<128x256xf32, #tpu.memory_space<vmem>>, vector<128x256xf32>
    %364 = vector.extract_strided_slice %166 {offsets = [28, 0], sizes = [1, 256], strides = [1, 1]} : vector<32x256xf32> to vector<1x256xf32>
    %365 = vector.broadcast %364 : vector<1x256xf32> to vector<128x256xf32>
    %366 = arith.mulf %363, %365 : vector<128x256xf32>
    %cst_235 = arith.constant dense<0xFF800000> : vector<128xf32>
    %367 = vector.multi_reduction <maximumf>, %366, %cst_235 [1] : vector<128x256xf32> to vector<128xf32>
    %368 = vector.shape_cast %367 : vector<128xf32> to vector<128x1xf32>
    %c0_236 = arith.constant 0 : index
    %c28 = arith.constant 28 : index
    %369 = vector.load %arg11[%c0_236, %c28] : memref<128x32xf32, #tpu.memory_space<vmem>>, vector<128x1xf32>
    tpu.vector_store %arg11[%c0_236, %c28], %368 {strides = array<i32>} : memref<128x32xf32, #tpu.memory_space<vmem>>, vector<128x1xf32>,
    %c0_237 = arith.constant 0 : index
    %c0_238 = arith.constant 0 : index
    %370 = vector.load %arg12[%c0_237, %c0_238] : memref<128x256xf32, #tpu.memory_space<vmem>>, vector<128x256xf32>
    %371 = vector.extract_strided_slice %166 {offsets = [29, 0], sizes = [1, 256], strides = [1, 1]} : vector<32x256xf32> to vector<1x256xf32>
    %372 = vector.broadcast %371 : vector<1x256xf32> to vector<128x256xf32>
    %373 = arith.mulf %370, %372 : vector<128x256xf32>
    %cst_239 = arith.constant dense<0xFF800000> : vector<128xf32>
    %374 = vector.multi_reduction <maximumf>, %373, %cst_239 [1] : vector<128x256xf32> to vector<128xf32>
    %375 = vector.shape_cast %374 : vector<128xf32> to vector<128x1xf32>
    %c0_240 = arith.constant 0 : index
    %c29 = arith.constant 29 : index
    %376 = vector.load %arg11[%c0_240, %c29] : memref<128x32xf32, #tpu.memory_space<vmem>>, vector<128x1xf32>
    tpu.vector_store %arg11[%c0_240, %c29], %375 {strides = array<i32>} : memref<128x32xf32, #tpu.memory_space<vmem>>, vector<128x1xf32>,
    %c0_241 = arith.constant 0 : index
    %c0_242 = arith.constant 0 : index
    %377 = vector.load %arg12[%c0_241, %c0_242] : memref<128x256xf32, #tpu.memory_space<vmem>>, vector<128x256xf32>
    %378 = vector.extract_strided_slice %166 {offsets = [30, 0], sizes = [1, 256], strides = [1, 1]} : vector<32x256xf32> to vector<1x256xf32>
    %379 = vector.broadcast %378 : vector<1x256xf32> to vector<128x256xf32>
    %380 = arith.mulf %377, %379 : vector<128x256xf32>
    %cst_243 = arith.constant dense<0xFF800000> : vector<128xf32>
    %381 = vector.multi_reduction <maximumf>, %380, %cst_243 [1] : vector<128x256xf32> to vector<128xf32>
    %382 = vector.shape_cast %381 : vector<128xf32> to vector<128x1xf32>
    %c0_244 = arith.constant 0 : index
    %c30 = arith.constant 30 : index
    %383 = vector.load %arg11[%c0_244, %c30] : memref<128x32xf32, #tpu.memory_space<vmem>>, vector<128x1xf32>
    tpu.vector_store %arg11[%c0_244, %c30], %382 {strides = array<i32>} : memref<128x32xf32, #tpu.memory_space<vmem>>, vector<128x1xf32>,
    %c0_245 = arith.constant 0 : index
    %c0_246 = arith.constant 0 : index
    %384 = vector.load %arg12[%c0_245, %c0_246] : memref<128x256xf32, #tpu.memory_space<vmem>>, vector<128x256xf32>
    %385 = vector.extract_strided_slice %166 {offsets = [31, 0], sizes = [1, 256], strides = [1, 1]} : vector<32x256xf32> to vector<1x256xf32>
    %386 = vector.broadcast %385 : vector<1x256xf32> to vector<128x256xf32>
    %387 = arith.mulf %384, %386 : vector<128x256xf32>
    %cst_247 = arith.constant dense<0xFF800000> : vector<128xf32>
    %388 = vector.multi_reduction <maximumf>, %387, %cst_247 [1] : vector<128x256xf32> to vector<128xf32>
    %389 = vector.shape_cast %388 : vector<128xf32> to vector<128x1xf32>
    %c0_248 = arith.constant 0 : index
    %c31 = arith.constant 31 : index
    %390 = vector.load %arg11[%c0_248, %c31] : memref<128x32xf32, #tpu.memory_space<vmem>>, vector<128x1xf32>
    tpu.vector_store %arg11[%c0_248, %c31], %389 {strides = array<i32>} : memref<128x32xf32, #tpu.memory_space<vmem>>, vector<128x1xf32>,
    return
  }
}

</mosaic_0001>

<bundles_post_ra>
// kernel: custom-call
= control target key start
LH: loop header
LB: loop body
LE: loop exit
PB: predicated region body
PF: predicated region fallthrough
CT: control target
= control target key end

     0   :  { %s6_s0 = inlined_call_operand.vmem [shape: u32[256], index: 0, kind: output, shape index: {}]  }

</bundles_post_ra>
